<compile_context>
chip_gen: v6e
topology: v6e:2x2x1
jax: 0.10.0
libtpu: 0.0.40
codegen_flags: <defaults>
</compile_context>

<pallas_src>
import jax
import jax.numpy as jnp
from jax import lax
from jax.experimental import pallas as pl
from jax.experimental.pallas import tpu as pltpu

# Contract dim 0 of the (H, tS) input tile with dim 1 ('in') of the (H, H)
# weight:  result[s, o] = sum_h x[h, s] * W'[o, h]  ==  (x^T @ W'^T)[s, o].
_XT_TIMES_WT = (((0,), (1,)), ((), ()))


def _fused_permute_linear_residual_kernel(x_ref, wp_ref, b_ref, o_ref):
    # x_ref : (1, H, tS)  raw (UNpermuted) input slab
    # wp_ref: (H, H)      W + I  (torch (out, in) layout), residual folded in
    # b_ref : (1, H)      bias row
    # o_ref : (1, tS, H)  output slab
    x = x_ref[0]                                            # (H, tS)
    acc = lax.dot_general(
        x, wp_ref[...], _XT_TIMES_WT,
        preferred_element_type=jnp.float32,
        precision=lax.Precision.HIGHEST,                    # true f32 MXU path
    )                                                       # (tS, H)
    o_ref[0] = (acc + b_ref[...]).astype(o_ref.dtype)


def _pick_s_tile(S: int) -> int:
    # MXU-native multiples; the input block's last dim must be a multiple of
    # 128 or the full extent S.
    for t in (512, 256, 128):
        if S % t == 0:
            return t
    return S


@jax.jit
def model_forward(x1, weight, bias):
    """x1: (B, H, S) f32, weight: (H, H) f32 (out, in), bias: (H,) -> (B, S, H).

    Implements: permute(0,2,1) -> Linear(W, b) -> (+ permuted input).
    """
    B, H, S = x1.shape
    # TODO(synk): `self.non_existing_func` has no definition in the reference
    # module (it raises at runtime in PyTorch); treated as identity here.
    # `.detach()` is a forward-pass no-op, so out = linear(v1) + v1,
    # which folds to x^T @ (W + I)^T + b.
    wp = weight + jnp.eye(H, dtype=weight.dtype)   # tiny one-time HxH add
    b2d = bias.reshape(1, H)                       # metadata-only reshape

    tS = _pick_s_tile(S)
    grid = (B, S // tS)

    return pl.pallas_call(
        _fused_permute_linear_residual_kernel,
        out_shape=jax.ShapeDtypeStruct((B, S, H), x1.dtype),
        grid=grid,
        in_specs=[
            pl.BlockSpec((1, H, tS), lambda b, s: (b, 0, s)),  # per-(batch,S) slab
            pl.BlockSpec((H, H), lambda b, s: (0, 0)),         # weight+I: resident
            pl.BlockSpec((1, H), lambda b, s: (0, 0)),         # bias:     resident
        ],
        out_specs=pl.BlockSpec((1, tS, H), lambda b, s: (b, s, 0)),
        compiler_params=pltpu.CompilerParams(
            dimension_semantics=("parallel", "parallel")),     # megacore over B and S
    )(x1, wp, b2d)


def _reference(x1, weight, bias):
    v1 = jnp.transpose(x1, (0, 2, 1))
    lin = jnp.einsum("bsh,oh->bso", v1, weight,
                     precision=lax.Precision.HIGHEST)
    return lin + bias + v1


if __name__ == "__main__":
    key = jax.random.PRNGKey(0)

    # --- Module-implied toy shape: x1 = (1, 2, 2), Linear(2, 2) ---
    k_x, k_w, k_b, k_x2, k_w2, k_b2 = jax.random.split(key, 6)
    B, H, S = 1, 2, 2
    x1 = jax.random.normal(k_x, (B, H, S), dtype=jnp.float32)
    weight = jax.random.normal(k_w, (H, H), dtype=jnp.float32) * 0.5
    bias = jax.random.normal(k_b, (H,), dtype=jnp.float32) * 0.1

    out = jax.block_until_ready(model_forward(x1, weight, bias))
    ref = _reference(x1, weight, bias)
    assert out.shape == (B, S, H)
    assert jnp.allclose(out, ref, atol=1e-5, rtol=1e-5), "mismatch (toy shape)"

    # --- Larger shape to exercise the (batch, S-tile) grid path ---
    B2, H2, S2 = 2, 256, 1024
    x1b = jax.random.normal(k_x2, (B2, H2, S2), dtype=jnp.float32)
    w2 = jax.random.normal(k_w2, (H2, H2), dtype=jnp.float32) * 0.05
    b2 = jax.random.normal(k_b2, (H2,), dtype=jnp.float32) * 0.1

    out2 = jax.block_until_ready(model_forward(x1b, w2, b2))
    ref2 = _reference(x1b, w2, b2)
    assert out2.shape == (B2, S2, H2)
    assert jnp.allclose(out2, ref2, atol=1e-4, rtol=1e-4), "mismatch (tiled shape)"

    print("KERNEL_OK")
</pallas_src>

<mosaic_0001>
module attributes {stable_mosaic.version = 11 : i64} {
  func.func @_fused_permute_linear_residual_kernel(%arg0: i32, %arg1: i32, %arg2: memref<1x2x2xf32, #tpu.memory_space<vmem>>, %arg3: memref<2x2xf32, #tpu.memory_space<vmem>>, %arg4: memref<1x2xf32, #tpu.memory_space<vmem>>, %arg5: memref<1x2x2xf32, #tpu.memory_space<vmem>>) attributes {dimension_semantics = [#tpu.dimension_semantics<parallel>, #tpu.dimension_semantics<parallel>], iteration_bounds = array<i64: 1, 1>, scalar_prefetch = 0 : i64, scratch_operands = 0 : i64, tpu.core_type = #tpu.core_type<tc>, window_params = [{transform_indices = @transform_0, window_bounds = array<i64: 1, 2, 2>}, {pipeline_mode = #tpu.pipeline_mode<synchronous>, transform_indices = @transform_1, window_bounds = array<i64: 2, 2>}, {pipeline_mode = #tpu.pipeline_mode<synchronous>, transform_indices = @transform_2, window_bounds = array<i64: 1, 2>}, {transform_indices = @transform_3, window_bounds = array<i64: 1, 2, 2>}]} {
    %c0 = arith.constant 0 : index
    %c0_0 = arith.constant 0 : index
    %c0_1 = arith.constant 0 : index
    %0 = vector.load %arg2[%c0, %c0_0, %c0_1] : memref<1x2x2xf32, #tpu.memory_space<vmem>>, vector<1x2x2xf32>
    %1 = vector.shape_cast %0 : vector<1x2x2xf32> to vector<2x2xf32>
    %c0_2 = arith.constant 0 : index
    %c0_3 = arith.constant 0 : index
    %2 = vector.load %arg3[%c0_2, %c0_3] : memref<2x2xf32, #tpu.memory_space<vmem>>, vector<2x2xf32>
    %cst = arith.constant dense<0.000000e+00> : vector<2x2xf32>
    %3 = tpu.matmul %1, %2, %cst {dimension_numbers = #tpu.dot_dimension_numbers<[0], [1], [1], [0], [0, 1, 1, 0], [], []>, precision = #tpu.contract_precision<fp32>} : vector<2x2xf32>, vector<2x2xf32>, vector<2x2xf32> -> vector<2x2xf32>
    %c0_4 = arith.constant 0 : index
    %c0_5 = arith.constant 0 : index
    %4 = vector.load %arg4[%c0_4, %c0_5] : memref<1x2xf32, #tpu.memory_space<vmem>>, vector<1x2xf32>
    %5 = vector.broadcast %4 : vector<1x2xf32> to vector<2x2xf32>
    %6 = arith.addf %3, %5 : vector<2x2xf32>
    %c0_6 = arith.constant 0 : index
    %c0_7 = arith.constant 0 : index
    %c0_8 = arith.constant 0 : index
    %7 = vector.load %arg5[%c0_6, %c0_7, %c0_8] : memref<1x2x2xf32, #tpu.memory_space<vmem>>, vector<1x2x2xf32>
    %8 = vector.shape_cast %7 : vector<1x2x2xf32> to vector<2x2xf32>
    %9 = vector.shape_cast %6 : vector<2x2xf32> to vector<1x2x2xf32>
    tpu.vector_store %arg5[%c0_6, %c0_7, %c0_8], %9 {strides = array<i32>} : memref<1x2x2xf32, #tpu.memory_space<vmem>>, vector<1x2x2xf32>,
    return
  }
  func.func @transform_0(%arg0: i32, %arg1: i32) -> (i32, i32, i32) {
    %c0_i32 = arith.constant 0 : i32
    %c0_i32_0 = arith.constant 0 : i32
    return %arg0, %c0_i32, %arg1 : i32, i32, i32
  }
  func.func @transform_1(%arg0: i32, %arg1: i32) -> (i32, i32) {
    %c0_i32 = arith.constant 0 : i32
    %c0_i32_0 = arith.constant 0 : i32
    %c0_i32_1 = arith.constant 0 : i32
    return %c0_i32, %c0_i32_0 : i32, i32
  }
  func.func @transform_2(%arg0: i32, %arg1: i32) -> (i32, i32) {
    %c0_i32 = arith.constant 0 : i32
    %c0_i32_0 = arith.constant 0 : i32
    %c0_i32_1 = arith.constant 0 : i32
    return %c0_i32, %c0_i32_0 : i32, i32
  }
  func.func @transform_3(%arg0: i32, %arg1: i32) -> (i32, i32, i32) {
    %c0_i32 = arith.constant 0 : i32
    %c0_i32_0 = arith.constant 0 : i32
    return %arg0, %arg1, %c0_i32 : i32, i32, i32
  }
}

</mosaic_0001>

<bundles_post_ra>
// kernel: model_forward.1
= control target key start
LH: loop header
LB: loop body
LE: loop exit
PB: predicated region body
PF: predicated region fallthrough
CT: control target
= control target key end

     0   :  { %vm56_vm0 = vcmask 15360   ;;  %v593_v2 = vmov 0.0   ;;  %s636_s0 = inlined_call_operand.vmem [shape: f32[1,2,2], index: 0, kind: input, shape index: {}]   ;;  %s637_s1 = inlined_call_operand.vmem [shape: f32[2,2], index: 1, kind: input, shape index: {}]   ;;  %s638_s2 = inlined_call_operand.vmem [shape: f32[1,2], index: 2, kind: input, shape index: {}]   ;;  %s639_s3 = inlined_call_operand.hbm [shape: f32[1,2,2], index: 3, kind: output, shape index: {}]  }
   0x1   :  { %v15_v0 = vld [vmem:[%s636_s0] sm:$0x3]  ;;  %543 = vmatprep.subr.mxu1 %v593_v2 }
   0x2   :  { %v16_v1 = vld [vmem:[%s637_s1] sm:$0x3]  ;;  %24 = vxpose.xlu0.b32.start.end [1/1] (short) (narrow) %v15_v0, 8 }
   0x3   :  { %v61_v3 = vsel %vm56_vm0, %v16_v1, 0 }
   0x4   :  { %8 = vsyncpa [#allocation3], 0  ;;  %v94_v4 = vand.u32 4294901760, %v61_v3  ;;  %vm594_vm1 = vmmov 0   ;;  %538 = vmatprep.subr.mxu0 %v593_v2  ;;  %v525_v20 = vld [vmem:[%s638_s2] ss:$0 sm:$0xff] }
   0x5   :  { %545 = vmatprep.mubr.msk.f32.mxu1 %vm594_vm1, %v593_v2  ;;  %540 = vmatprep.mubr.msk.f32.mxu0 %vm594_vm1, %v593_v2  ;;  %s595_s16 = smov [#allocation2]   ;;  %vm509_vm2 = vcmask 9216  }
   0x6   :  { %v171_v5 = vsub.f32 %v61_v3, %v94_v4  ;;  %539 = vmatpush3.xpose.msra.mxu0 %v94_v4  ;;  %s517_s17 = sshll.u32 %s595_s16, 4  ;;  %s518_s17 = int_to_ptr.vmem [resolvable:$true] %s517_s17 }
   0x7   :  { %548 = vmatprep.subr.mxu0 %v593_v2  ;;  %s571_s2 = scalar_lea.vmem %s518_s17, 32  ;;  %p576_p1 = scmp.lt.s32.totalorder %s518_s17, %s518_s17 }
   0x8   :  { %v172_v6 = vand.u32 4294901760, %v171_v5  ;;  %p572_p0 = scmp.ne.s32.totalorder %s518_s17, %s571_s2  ;;  %p577_p2 = scmp.lt.s32.totalorder %s571_s2, %s571_s2 }
   0xa   :  { %v173_v7 = vsub.f32 %v171_v5, %v172_v6  ;;  %p578_p3 = por %p577_p2, %p576_p1 }
   0xc   :  { %v174_v8 = vand.u32 4294901760, %v173_v7  ;;  %p579_p4 = pnand %p578_p3, %p572_p0 }
   0xe   :  { %544 = vmatpush3.xpose.msra.mxu1 %v174_v8 }
   0xf   :  { %553 = vmatprep.subr.mxu1 %v593_v2 }
  0x7e   :  { %v40_v9 = vpop.trf.xlu0 }
  0x7f   :  { %v58_v10 = vsel %vm56_vm0, %v40_v9, 0 }
  0x80   :  { %v129_v11 = vand.u32 4294901760, %v58_v10 }
  0x82   :  { %v130_v12 = vsub.f32 %v58_v10, %v129_v11  ;;  %546 = vmatmul.mubr.f32.vlgmr.msra.gmra.mxu1 %v129_v11 }
  0x83   :  { %554 = vmatpush3.xpose.msra.mxu1 %v94_v4  ;;  %555 = vmatprep.mubr.msk.f32.mxu1 %vm594_vm1, %v593_v2 }
  0x84   :  { %v131_v13 = vand.u32 4294901760, %v130_v12  ;;  %563 = vmatprep.subr.mxu1 %v593_v2 }
  0x86   :  { %556 = vmatmul.mubr.f32.vlgmr.msra.gmra.mxu1 %v131_v13  ;;  %v132_v14 = vsub.f32 %v130_v12, %v131_v13 }
  0x87   :  { %564 = vmatpush3.xpose.msra.mxu1 %v94_v4  ;;  %565 = vmatprep.mubr.msk.f32.mxu1 %vm594_vm1, %v593_v2 }
  0x88   :  { %v133_v15 = vand.u32 4294901760, %v132_v14 }
  0x8a   :  { %541 = vmatmul.mubr.f32.vlgmr.msra.gmra.mxu0 %v133_v15  ;;  %566 = vmatmul.mubr.f32.vlgmr.msra.gmra.mxu1 %v129_v11 }
  0x8b   :  { %549 = vmatpush3.xpose.msra.mxu0 %v171_v5  ;;  %550 = vmatprep.mubr.msk.f32.mxu0 %vm594_vm1, %v593_v2 }
  0x8c   :  { %558 = vmatprep.subr.mxu0 %v593_v2 }
  0x8e   :  { %551 = vmatmul.mubr.f32.vlgmr.msra.gmra.mxu0 %v130_v12 }
  0x8f   :  { %559 = vmatpush3.xpose.msra.mxu0 %v172_v6  ;;  %560 = vmatprep.mubr.msk.f32.mxu0 %vm594_vm1, %v593_v2 }
  0x92   :  { %561 = vmatmul.mubr.f32.vlgmr.msra.gmra.mxu0 %v129_v11 }
 0x142   :  { %v211_v16 = vpop.f32.mrf.mxu1 }
 0x144   :  { %v547_v17 = vpop.f32.mrf.mxu1 }
 0x146   :  { %v359_v18 = vpop.f32.mrf.mxu1 }
 0x148   :  { %v557_v19 = vpop.f32.mrf.mxu1 }
 0x14a   :  { %v135_v21 = vpop.f32.mrf.mxu0  ;;  %v505_v22 = vpop.f32.mrf.mxu1 }
 0x14b   :  { %v136_v23 = vadd.f32 %v525_v20, %v135_v21 }
 0x14c   :  { %v542_v24 = vpop.f32.mrf.mxu0  ;;  %v567_v25 = vpop.f32.mrf.mxu1 }
 0x14d   :  { %v212_v26 = vadd.f32 %v211_v16, %v136_v23 }
 0x14e   :  { %v285_v27 = vpop.f32.mrf.mxu0 }
 0x14f   :  { %v286_v28 = vadd.f32 %v285_v27, %v212_v26 }
 0x150   :  { %v552_v29 = vpop.f32.mrf.mxu0 }
 0x151   :  { %v360_v30 = vadd.f32 %v359_v18, %v286_v28 }
 0x152   :  { %v433_v31 = vpop.f32.mrf.mxu0 }
 0x153   :  { %v434_v32 = vadd.f32 %v433_v31, %v360_v30 }
 0x154   :  { %v562_v33 = vpop.f32.mrf.mxu0 }
 0x155   :  { %v506_v34 = vadd.f32 %v505_v22, %v434_v32 }
 0x157   :  { %510 = vst.msk [vmem:[#allocation2] sm:$0x3] %vm509_vm2, %v506_v34 }
 0x158   :  { %582 = shalt.err (!%p579_p4)
}
 0x159   :  { %520 = dma.vmem_to_hbm [thread:$0]  %s518_s17, 32, %s639_s3, [#allocation3]  }
 0x15a   :  { %591 = dma.done.wait [#allocation3], 32  }
 0x15b   :  { %592 = vsyncadd [#allocation3], 4294967264 }
 0x15c   :  { %524 = vsyncpa [#allocation3], 1 }

</bundles_post_ra>
